<compile_context>
chip_gen: v7x
topology: tpu7x:2x2x1
jax: 0.10.0
libtpu: 0.0.40
codegen_flags: <defaults>
</compile_context>

<pallas_src>
import functools

import jax
import jax.numpy as jnp
from jax import lax
from jax.experimental import pallas as pl
from jax.experimental.pallas import tpu as pltpu

# ----- "cfg" values (synthetic, small) --------------------------------------
MODEL_SEMANTIC_EMBEDDING_DIM = 4
MODEL_HEAD_EMBEDDING_DIM = 8
IN_DIM = MODEL_SEMANTIC_EMBEDDING_DIM + 1          # 5
OUT_DIM = MODEL_HEAD_EMBEDDING_DIM                 # 8
KERNEL_SIZE = 7
BN_EPS = 1e-5


# ----- Pallas kernel ---------------------------------------------------------
def global_atten_kernel(x_ref, w_ref, head_ref, o_ref, *, cout):
    """One lane tile of fused (im2col conv1 + bias + BN) -> ReLU -> 1x1 conv.

    x_ref   : (Kpad, T)     im2col patches (+ ones row, + zero pad rows)
    w_ref   : (cout, Kpad)  conv1 weights with BN folded; col KKCin = folded bias
    head_ref: (cout+1, 1)   [conv2 weight (cout rows); conv2 bias (last row)]
    o_ref   : (1, T)        output pixels for this tile (lane-dense)
    """
    # conv1 + bias + BN as a single MXU matmul: (cout, Kpad) @ (Kpad, T).
    y = lax.dot_general(
        w_ref[...], x_ref[...],
        dimension_numbers=(((1,), (0,)), ((), ())),
        preferred_element_type=jnp.float32)             # (cout, T)
    y = jnp.maximum(y, 0.0)                             # ReLU (VPU)

    w2 = head_ref[0:cout, :]                            # (cout, 1)
    b2 = head_ref[cout:cout + 1, :]                     # (1, 1)
    # 1x1 conv == per-pixel channel reduction: broadcast mul + 8-sublane reduce.
    out = jnp.sum(y * w2, axis=0, keepdims=True) + b2   # (1, T)
    o_ref[...] = out.astype(o_ref.dtype)


# ----- Wrapper ---------------------------------------------------------------
def global_atten_forward(x_nchw, params, *, lane_tile=2048):
    """x_nchw: (N, Cin, H, W) float32.  Returns (N, 1, H, W) float32."""
    N, Cin, H, W = x_nchw.shape
    K = KERNEL_SIZE
    pad = (K - 1) // 2
    Cout = params["w1"].shape[-1]
    HW = H * W
    total = N * HW
    KKCin = K * K * Cin
    Kaug = KKCin + 1                       # + ones row carrying the folded bias
    Kpad = ((Kaug + 7) // 8) * 8           # sublane-aligned reduction length

    # ---- layout plumbing (wrapper-side, data movement only) -----------------
    x_pad = jnp.pad(x_nchw, ((0, 0), (0, 0), (pad, pad), (pad, pad)))
    taps = []
    for ky in range(K):
        for kx in range(K):
            taps.append(x_pad[:, :, ky:ky + H, kx:kx + W].reshape(N, Cin, HW))
    patches = jnp.concatenate(taps, axis=1)                      # (N, KKCin, HW)
    ones = jnp.ones((N, 1, HW), x_nchw.dtype)
    zrow = jnp.zeros((N, Kpad - Kaug, HW), x_nchw.dtype)
    x_aug = jnp.concatenate([patches, ones, zrow], axis=1)       # (N, Kpad, HW)
    # Pixels (batch fused with spatial) on the lane axis.
    x_all = jnp.transpose(x_aug, (1, 0, 2)).reshape(Kpad, total)

    # Lane tile: multiple of 128; pad the pixel axis up to a whole tile.
    if total <= lane_tile:
        T = ((total + 127) // 128) * 128
    else:
        T = lane_tile
    P = ((total + T - 1) // T) * T
    if P != total:
        x_all = jnp.pad(x_all, ((0, 0), (0, P - total)))

    # ---- parameter folding (BN -> conv1 affine; bias -> extra weight column) -
    # TODO(synk): SynchronizedBatchNorm2d training-mode (cross-device batch
    # statistics) not implemented; inference running-stat BN is folded here.
    scale = params["bn_gamma"] / jnp.sqrt(params["bn_var"] + BN_EPS)   # (Cout,)
    shift = params["bn_beta"] - params["bn_mean"] * scale
    w1_flat = params["w1"].reshape(KKCin, Cout)          # [ky, kx, cin] x cout
    w1_folded = (w1_flat * scale[None, :]).T             # (Cout, KKCin)
    b1_folded = (params["b1"] * scale + shift)[:, None]  # (Cout, 1)
    wz = jnp.zeros((Cout, Kpad - Kaug), jnp.float32)
    w_aug = jnp.concatenate([w1_folded, b1_folded, wz], axis=1)    # (Cout, Kpad)

    # Pack the tiny conv2 weight + bias into one operand: (Cout+1, 1).
    head = jnp.concatenate([params["w2"], params["b2"].reshape(1, 1)], axis=0)

    out_flat = pl.pallas_call(
        functools.partial(global_atten_kernel, cout=Cout),
        out_shape=jax.ShapeDtypeStruct((1, P), jnp.float32),
        grid=(P // T,),
        in_specs=[
            pl.BlockSpec((Kpad, T), lambda s: (0, s)),
            pl.BlockSpec((Cout, Kpad), lambda s: (0, 0)),
            pl.BlockSpec((Cout + 1, 1), lambda s: (0, 0)),
        ],
        out_specs=pl.BlockSpec((1, T), lambda s: (0, s)),
        compiler_params=pltpu.CompilerParams(
            dimension_semantics=("parallel",)),
    )(x_all, w_aug, head)

    return out_flat[0, :total].reshape(N, 1, H, W)                 # NCHW


# ----- Deterministic parameter init (mirrors the module's __init__) ----------
def init_params(key):
    k1, k2, k3, k4, k5, k6 = jax.random.split(key, 6)
    K = KERNEL_SIZE

    # conv1: kaiming_normal_ fan_out, relu -> std = sqrt(2 / (Cout*K*K))
    std1 = (2.0 / (OUT_DIM * K * K)) ** 0.5
    w1 = std1 * jax.random.normal(k1, (K, K, IN_DIM, OUT_DIM), jnp.float32)
    bound1 = 1.0 / (IN_DIM * K * K) ** 0.5
    b1 = jax.random.uniform(k2, (OUT_DIM,), jnp.float32, -bound1, bound1)

    # conv2 (1x1): kaiming_normal_ fan_out, relu -> std = sqrt(2 / (1*1*1))
    std2 = (2.0 / 1.0) ** 0.5
    w2 = std2 * jax.random.normal(k3, (OUT_DIM, 1), jnp.float32)
    bound2 = 1.0 / (OUT_DIM * 1 * 1) ** 0.5
    b2 = jax.random.uniform(k4, (1,), jnp.float32, -bound2, bound2)

    # BN: affine defaults (gamma=1, beta=0); non-trivial running stats so the
    # affine path is actually exercised.
    bn_gamma = jnp.ones((OUT_DIM,), jnp.float32)
    bn_beta = jnp.zeros((OUT_DIM,), jnp.float32)
    bn_mean = 0.1 * jax.random.normal(k5, (OUT_DIM,), jnp.float32)
    bn_var = 1.0 + 0.1 * jax.random.uniform(k6, (OUT_DIM,), jnp.float32)

    return dict(w1=w1, b1=b1, w2=w2, b2=b2, bn_gamma=bn_gamma,
                bn_beta=bn_beta, bn_mean=bn_mean, bn_var=bn_var)


# ----- Pure-JAX reference (for correctness check) ----------------------------
def global_atten_reference(x_nchw, params):
    x = jnp.transpose(x_nchw, (0, 2, 3, 1))                        # NHWC
    y = lax.conv_general_dilated(
        x, params["w1"], window_strides=(1, 1), padding="SAME",
        dimension_numbers=("NHWC", "HWIO", "NHWC")) + params["b1"]
    scale = params["bn_gamma"] / jnp.sqrt(params["bn_var"] + BN_EPS)
    shift = params["bn_beta"] - params["bn_mean"] * scale
    y = y * scale + shift
    y = jnp.maximum(y, 0.0)
    out = jnp.einsum("nhwc,co->nhwo", y, params["w2"]) + params["b2"]
    return jnp.transpose(out, (0, 3, 1, 2))                        # NCHW


if __name__ == "__main__":
    key = jax.random.PRNGKey(0)
    kp, kx = jax.random.split(key)
    params = init_params(kp)

    N, H, W = 2, 16, 16
    x = jax.random.normal(kx, (N, IN_DIM, H, W), jnp.float32)      # NCHW

    out = jax.block_until_ready(global_atten_forward(x, params))
    ref = jax.block_until_ready(global_atten_reference(x, params))

    assert out.shape == (N, 1, H, W), out.shape
    assert jnp.allclose(out, ref, atol=1e-4, rtol=1e-4), \
        float(jnp.max(jnp.abs(out - ref)))

    print("KERNEL_OK")
</pallas_src>

<mosaic_0001>
module attributes {stable_mosaic.version = 11 : i64} {
  func.func @global_atten_kernel(%arg0: i32, %arg1: memref<248x512xf32, #tpu.memory_space<vmem>>, %arg2: memref<8x248xf32, #tpu.memory_space<vmem>>, %arg3: memref<9x1xf32, #tpu.memory_space<vmem>>, %arg4: memref<1x512xf32, #tpu.memory_space<vmem>>) attributes {dimension_semantics = [#tpu.dimension_semantics<parallel>], iteration_bounds = array<i64: 1>, scalar_prefetch = 0 : i64, scratch_operands = 0 : i64, tpu.core_type = #tpu.core_type<tc>, window_params = [{transform_indices = @transform_0, window_bounds = array<i64: 248, 512>}, {pipeline_mode = #tpu.pipeline_mode<synchronous>, transform_indices = @transform_1, window_bounds = array<i64: 8, 248>}, {pipeline_mode = #tpu.pipeline_mode<synchronous>, transform_indices = @transform_2, window_bounds = array<i64: 9, 1>}, {transform_indices = @transform_3, window_bounds = array<i64: 1, 512>}]} {
    %c0 = arith.constant 0 : index
    %c0_0 = arith.constant 0 : index
    %0 = vector.load %arg2[%c0, %c0_0] : memref<8x248xf32, #tpu.memory_space<vmem>>, vector<8x248xf32>
    %c0_1 = arith.constant 0 : index
    %c0_2 = arith.constant 0 : index
    %1 = vector.load %arg1[%c0_1, %c0_2] : memref<248x512xf32, #tpu.memory_space<vmem>>, vector<248x512xf32>
    %cst = arith.constant dense<0.000000e+00> : vector<8x512xf32>
    %2 = tpu.matmul %0, %1, %cst {dimension_numbers = #tpu.dot_dimension_numbers<[1], [0], [0], [1], [0, 0, 1, 1], [], []>} : vector<8x248xf32>, vector<248x512xf32>, vector<8x512xf32> -> vector<8x512xf32>
    %cst_3 = arith.constant 0.000000e+00 : f32
    %3 = vector.broadcast %cst_3 : f32 to vector<8x512xf32>
    %4 = arith.maximumf %2, %3 : vector<8x512xf32>
    %c0_4 = arith.constant 0 : index
    %c0_5 = arith.constant 0 : index
    %5 = vector.load %arg3[%c0_4, %c0_5] : memref<9x1xf32, #tpu.memory_space<vmem>>, vector<8x1xf32>
    %c8 = arith.constant 8 : index
    %c0_6 = arith.constant 0 : index
    %6 = vector.load %arg3[%c8, %c0_6] : memref<9x1xf32, #tpu.memory_space<vmem>>, vector<1x1xf32>
    %7 = vector.broadcast %5 : vector<8x1xf32> to vector<8x512xf32>
    %8 = arith.mulf %4, %7 : vector<8x512xf32>
    %cst_7 = arith.constant dense<0.000000e+00> : vector<512xf32>
    %9 = vector.multi_reduction <add>, %8, %cst_7 [0] : vector<8x512xf32> to vector<512xf32>
    %10 = vector.shape_cast %9 : vector<512xf32> to vector<1x512xf32>
    %11 = vector.broadcast %6 : vector<1x1xf32> to vector<1x512xf32>
    %12 = arith.addf %10, %11 : vector<1x512xf32>
    %c0_8 = arith.constant 0 : index
    %c0_9 = arith.constant 0 : index
    %13 = vector.load %arg4[%c0_8, %c0_9] : memref<1x512xf32, #tpu.memory_space<vmem>>, vector<1x512xf32>
    tpu.vector_store %arg4[%c0_8, %c0_9], %12 {strides = array<i32>} : memref<1x512xf32, #tpu.memory_space<vmem>>, vector<1x512xf32>,
    return
  }
  func.func @transform_0(%arg0: i32) -> (i32, i32) {
    %c0_i32 = arith.constant 0 : i32
    %c0_i32_0 = arith.constant 0 : i32
    return %c0_i32, %arg0 : i32, i32
  }
  func.func @transform_1(%arg0: i32) -> (i32, i32) {
    %c0_i32 = arith.constant 0 : i32
    %c0_i32_0 = arith.constant 0 : i32
    %c0_i32_1 = arith.constant 0 : i32
    return %c0_i32, %c0_i32_0 : i32, i32
  }
  func.func @transform_2(%arg0: i32) -> (i32, i32) {
    %c0_i32 = arith.constant 0 : i32
    %c0_i32_0 = arith.constant 0 : i32
    %c0_i32_1 = arith.constant 0 : i32
    return %c0_i32, %c0_i32_0 : i32, i32
  }
  func.func @transform_3(%arg0: i32) -> (i32, i32) {
    %c0_i32 = arith.constant 0 : i32
    %c0_i32_0 = arith.constant 0 : i32
    return %c0_i32, %arg0 : i32, i32
  }
}

</mosaic_0001>

<bundles_post_ra>
// kernel: tpu_custom_call.1
= control target key start
LH: loop header
LB: loop body
LE: loop exit
PB: predicated region body
PF: predicated region fallthrough
CT: control target
= control target key end

     0   :  { %8 = vsyncpa [#allocation3], 0  ;;  %s639_s0 = inlined_call_operand.hbm [shape: f32[248,512], index: 0, kind: input, shape index: {}]   ;;  %s640_s1 = inlined_call_operand.vmem [shape: f32[8,248], index: 1, kind: input, shape index: {}]   ;;  %s641_s2 = inlined_call_operand.vmem [shape: f32[9,1], index: 2, kind: input, shape index: {}]   ;;  %s642_s3 = inlined_call_operand.hbm [shape: f32[1,512], index: 3, kind: output, shape index: {}]  }
   0x1   :  { %9 = vsyncpa [#allocation4], 0  ;;  %s575_s12 = smov [#allocation2]   ;;  %s527_s16 = scalar_lea.hbm %s639_s0, 15872 }
   0x2   :  { %s15_s13 = sshll.u32 %s575_s12, 4  ;;  %p528_p0 = scmp.ne.s32.totalorder %s639_s0, %s527_s16  ;;  %s16_s13 = int_to_ptr.vmem [resolvable:$true] %s15_s13 }
   0x3   :  { %p531_p1 = scmp.lt.u32.totalorder %s527_s16, %s639_s0 }
   0x5   :  { %p533_p2 = pnand %p531_p1, %p528_p0 }
   0x7   :  { %536 = shalt.err (!%p533_p2)
}
   0x8   :  { %s537_s21 = scalar_lea.vmem %s16_s13, 15872  ;;  %p542_p4 = scmp.lt.s32.totalorder %s16_s13, %s16_s13 }
   0x9   :  { %p538_p3 = scmp.ne.s32.totalorder %s16_s13, %s537_s21  ;;  %p543_p5 = scmp.lt.s32.totalorder %s537_s21, %s537_s21 }
   0xb   :  { %p544_p6 = por %p543_p5, %p542_p4 }
   0xd   :  { %p545_p7 = pnand %p544_p6, %p538_p3 }
   0xf   :  { %548 = shalt.err (!%p545_p7)
}
  0x10   :  { %s576_s22 = smov 512   ;;  %s577_s23 = smov 32  }
  0x11   :  { %21 = dma.hbm_to_vmem [thread:$0]  %s639_s0, 15872, %s16_s13, [#allocation3], %s576_s22, %s576_s22, %s577_s23  }
  0x12   :  { %571 = dma.done.wait [#allocation3], 15872  }
  0x13   :  { %572 = vsyncadd [#allocation3], 4294951424  ;;  %v578_v0 = vmov 0   ;;  %v32_v1 = vld [vmem:[#allocation2 + $0x8] sm:$0xff]  ;;  %v34_v3 = vld [vmem:[#allocation2 + $0x18] sm:$0xff]  ;;  %vm155_vm0 = vcmask 982016  }
  0x14   :  { %526 = vset.pattern.permute.xlu0 %v578_v0  ;;  %v36_v2 = vld [vmem:[#allocation2 + $0x28] sm:$0xff]  ;;  %v38_v5 = vld [vmem:[#allocation2 + $0x38] sm:$0xff]  ;;  %v31_v6 = vld [vmem:[#allocation2] sm:$0xff] }
  0x15   :  { %v400_v4 = vpack.c.bf16 %v36_v2, %v32_v1  ;;  %v35_v7 = vld [vmem:[#allocation2 + $0x20] sm:$0xff]  ;;  %v460_v8 = vpack.c.bf16 %v38_v5, %v34_v3  ;;  %v33_v10 = vld [vmem:[#allocation2 + $0x10] sm:$0xff]  ;;  %v40_v12 = vld [vmem:[#allocation2 + $0x48] sm:$0xff] }
  0x16   :  { %v402_v9 = vpack.c.bf16 %v35_v7, %v31_v6  ;;  %v37_v11 = vld [vmem:[#allocation2 + $0x30] sm:$0xff]  ;;  %v44_v14 = vld [vmem:[#allocation2 + $0x68] sm:$0xff]  ;;  %v42_v15 = vld [vmem:[#allocation2 + $0x58] sm:$0xff] }
  0x17   :  { %401 = vmatprep.subr.bf16.mxu0 %v400_v4  ;;  %v462_v13 = vpack.c.bf16 %v37_v11, %v33_v10  ;;  %v46_v16 = vld [vmem:[#allocation2 + $0x78] sm:$0xff]  ;;  %461 = vmatprep.subr.bf16.mxu1 %v460_v8  ;;  %v404_v17 = vpack.c.bf16 %v44_v14, %v40_v12  ;;  %v39_v19 = vld [vmem:[#allocation2 + $0x40] sm:$0xff]  ;;  %v41_v21 = vld [vmem:[#allocation2 + $0x50] sm:$0xff] }
  0x18   :  { %403 = vmatpush1.bf16.msra.mxu0 %v402_v9  ;;  %v464_v18 = vpack.c.bf16 %v46_v16, %v42_v15  ;;  %v43_v20 = vld [vmem:[#allocation2 + $0x60] sm:$0xff]  ;;  %v45_v23 = vld [vmem:[#allocation2 + $0x70] sm:$0xff]  ;;  %v48_v24 = vld [vmem:[#allocation2 + $0x88] sm:$0xff] }
  0x19   :  { %463 = vmatpush1.bf16.msra.mxu1 %v462_v13  ;;  %v406_v22 = vpack.c.bf16 %v43_v20, %v39_v19  ;;  %v52_v25 = vld [vmem:[#allocation2 + $0xa8] sm:$0xff]  ;;  %405 = vmatprep.subr.bf16.mxu0 %v404_v17  ;;  %v466_v26 = vpack.c.bf16 %v45_v23, %v41_v21  ;;  %v50_v28 = vld [vmem:[#allocation2 + $0x98] sm:$0xff]  ;;  %v47_v30 = vld [vmem:[#allocation2 + $0x80] sm:$0xff] }
  0x1a   :  { %465 = vmatprep.subr.bf16.mxu1 %v464_v18  ;;  %v408_v27 = vpack.c.bf16 %v52_v25, %v48_v24  ;;  %v54_v29 = vld [vmem:[#allocation2 + $0xb8] sm:$0xff]  ;;  %v51_v32 = vld [vmem:[#allocation2 + $0xa0] sm:$0xff]  ;;  %v49_v33 = vld [vmem:[#allocation2 + $0x90] sm:$0xff] }
  0x1b   :  { %v468_v31 = vpack.c.bf16 %v54_v29, %v50_v28  ;;  %v53_v34 = vld [vmem:[#allocation2 + $0xb0] sm:$0xff]  ;;  %v410_v35 = vpack.c.bf16 %v51_v32, %v47_v30  ;;  %v56_v36 = vld [vmem:[#allocation2 + $0xc8] sm:$0xff]  ;;  %v58_v38 = vld [vmem:[#allocation2 + $0xd8] sm:$0xff] }
  0x1c   :  { %407 = vmatpush1.bf16.msra.mxu0 %v406_v22  ;;  %v60_v37 = vld [vmem:[#allocation2 + $0xe8] sm:$0xff]  ;;  %v470_v39 = vpack.c.bf16 %v53_v34, %v49_v33  ;;  %v62_v41 = vld [vmem:[#allocation2 + $0xf8] sm:$0xff]  ;;  %v55_v42 = vld [vmem:[#allocation2 + $0xc0] sm:$0xff] }
  0x1d   :  { %467 = vmatpush1.bf16.msra.mxu1 %v466_v26  ;;  %409 = vmatprep.subr.bf16.mxu0 %v408_v27  ;;  %v412_v40 = vpack.c.bf16 %v60_v37, %v56_v36  ;;  %v59_v43 = vld [vmem:[#allocation2 + $0xe0] sm:$0xff]  ;;  %v472_v44 = vpack.c.bf16 %v62_v41, %v58_v38  ;;  %v57_v45 = vld [vmem:[#allocation2 + $0xd0] sm:$0xff]  ;;  %v64_v47 = vld [vmem:[#allocation2 + $0x108] sm:$0xff] }
  0x1e   :  { %469 = vmatprep.subr.bf16.mxu1 %v468_v31  ;;  %v61_v46 = vld [vmem:[#allocation2 + $0xf0] sm:$0xff]  ;;  %v68_v48 = vld [vmem:[#allocation2 + $0x128] sm:$0xff]  ;;  %v66_v49 = vld [vmem:[#allocation2 + $0x118] sm:$0xff]  ;;  %v414_v51 = vpack.c.bf16 %v59_v43, %v55_v42 }
  0x1f   :  { %v70_v50 = vld [vmem:[#allocation2 + $0x138] sm:$0xff]  ;;  %v474_v52 = vpack.c.bf16 %v61_v46, %v57_v45  ;;  %v416_v53 = vpack.c.bf16 %v68_v48, %v64_v47  ;;  %v63_v54 = vld [vmem:[#allocation2 + $0x100] sm:$0xff]  ;;  %v65_v56 = vld [vmem:[#allocation2 + $0x110] sm:$0xff] }
  0x20   :  { %411 = vmatpush1.bf16.msra.mxu0 %v410_v35  ;;  %v67_v55 = vld [vmem:[#allocation2 + $0x120] sm:$0xff]  ;;  %v476_v57 = vpack.c.bf16 %v70_v50, %v66_v49  ;;  %v69_v58 = vld [vmem:[#allocation2 + $0x130] sm:$0xff]  ;;  %v72_v59 = vld [vmem:[#allocation2 + $0x148] sm:$0xff] }
  0x21   :  { %471 = vmatpush1.bf16.msra.mxu1 %v470_v39  ;;  %413 = vmatprep.subr.bf16.mxu0 %v412_v40  ;;  %v76_v60 = vld [vmem:[#allocation2 + $0x168] sm:$0xff]  ;;  %v74_v61 = vld [vmem:[#allocation2 + $0x158] sm:$0xff]  ;;  %v418_v63 = vpack.c.bf16 %v67_v55, %v63_v54  ;;  %v478_v0 = vpack.c.bf16 %v69_v58, %v65_v56  ;;  %v71_v2 = vld [vmem:[#allocation2 + $0x140] sm:$0xff] }
  0x22   :  { %473 = vmatprep.subr.bf16.mxu1 %v472_v44  ;;  %v78_v62 = vld [vmem:[#allocation2 + $0x178] sm:$0xff]  ;;  %v420_v1 = vpack.c.bf16 %v76_v60, %v72_v59  ;;  %v75_v3 = vld [vmem:[#allocation2 + $0x160] sm:$0xff]  ;;  %v73_v4 = vld [vmem:[#allocation2 + $0x150] sm:$0xff] }
  0x23   :  { %v480_v5 = vpack.c.bf16 %v78_v62, %v74_v61  ;;  %v77_v6 = vld [vmem:[#allocation2 + $0x170] sm:$0xff]  ;;  %v80_v7 = vld [vmem:[#allocation2 + $0x188] sm:$0xff]  ;;  %v82_v9 = vld [vmem:[#allocation2 + $0x198] sm:$0xff]  ;;  %v422_v11 = vpack.c.bf16 %v75_v3, %v71_v2 }
  0x24   :  { %415 = vmatpush1.bf16.msra.mxu0 %v414_v51  ;;  %v84_v8 = vld [vmem:[#allocation2 + $0x1a8] sm:$0xff]  ;;  %v86_v10 = vld [vmem:[#allocation2 + $0x1b8] sm:$0xff]  ;;  %v482_v12 = vpack.c.bf16 %v77_v6, %v73_v4  ;;  %v79_v14 = vld [vmem:[#allocation2 + $0x180] sm:$0xff] }
  0x25   :  { %475 = vmatpush1.bf16.msra.mxu1 %v474_v52  ;;  %417 = vmatprep.subr.bf16.mxu0 %v416_v53  ;;  %v424_v13 = vpack.c.bf16 %v84_v8, %v80_v7  ;;  %v83_v15 = vld [vmem:[#allocation2 + $0x1a0] sm:$0xff]  ;;  %v81_v16 = vld [vmem:[#allocation2 + $0x190] sm:$0xff]  ;;  %v484_v17 = vpack.c.bf16 %v86_v10, %v82_v9  ;;  %v88_v19 = vld [vmem:[#allocation2 + $0x1c8] sm:$0xff] }
  0x26   :  { %477 = vmatprep.subr.bf16.mxu1 %v476_v57  ;;  %v85_v18 = vld [vmem:[#allocation2 + $0x1b0] sm:$0xff]  ;;  %v92_v20 = vld [vmem:[#allocation2 + $0x1e8] sm:$0xff]  ;;  %v90_v21 = vld [vmem:[#allocation2 + $0x1d8] sm:$0xff]  ;;  %v426_v23 = vpack.c.bf16 %v83_v15, %v79_v14 }
  0x27   :  { %v94_v22 = vld [vmem:[#allocation2 + $0x1f8] sm:$0xff]  ;;  %v486_v24 = vpack.c.bf16 %v85_v18, %v81_v16  ;;  %v428_v25 = vpack.c.bf16 %v92_v20, %v88_v19  ;;  %v87_v26 = vld [vmem:[#allocation2 + $0x1c0] sm:$0xff]  ;;  %v89_v28 = vld [vmem:[#allocation2 + $0x1d0] sm:$0xff] }
  0x28   :  { %419 = vmatpush1.bf16.msra.mxu0 %v418_v63  ;;  %v91_v27 = vld [vmem:[#allocation2 + $0x1e0] sm:$0xff]  ;;  %v488_v29 = vpack.c.bf16 %v94_v22, %v90_v21  ;;  %v93_v30 = vld [vmem:[#allocation2 + $0x1f0] sm:$0xff]  ;;  %v96_v31 = vld [vmem:[#allocation2 + $0x208] sm:$0xff] }
  0x29   :  { %479 = vmatpush1.bf16.msra.mxu1 %v478_v0  ;;  %421 = vmatprep.subr.bf16.mxu0 %v420_v1  ;;  %v100_v32 = vld [vmem:[#allocation2 + $0x228] sm:$0xff]  ;;  %v98_v33 = vld [vmem:[#allocation2 + $0x218] sm:$0xff]  ;;  %v430_v35 = vpack.c.bf16 %v91_v27, %v87_v26  ;;  %v490_v36 = vpack.c.bf16 %v93_v30, %v89_v28  ;;  %v95_v38 = vld [vmem:[#allocation2 + $0x200] sm:$0xff] }
  0x2a   :  { %481 = vmatprep.subr.bf16.mxu1 %v480_v5  ;;  %v102_v34 = vld [vmem:[#allocation2 + $0x238] sm:$0xff]  ;;  %v432_v37 = vpack.c.bf16 %v100_v32, %v96_v31  ;;  %v99_v39 = vld [vmem:[#allocation2 + $0x220] sm:$0xff]  ;;  %v97_v40 = vld [vmem:[#allocation2 + $0x210] sm:$0xff] }
  0x2b   :  { %v492_v41 = vpack.c.bf16 %v102_v34, %v98_v33  ;;  %v101_v42 = vld [vmem:[#allocation2 + $0x230] sm:$0xff]  ;;  %v104_v43 = vld [vmem:[#allocation2 + $0x248] sm:$0xff]  ;;  %v106_v45 = vld [vmem:[#allocation2 + $0x258] sm:$0xff]  ;;  %v434_v47 = vpack.c.bf16 %v99_v39, %v95_v38 }
  0x2c   :  { %423 = vmatpush1.bf16.msra.mxu0 %v422_v11  ;;  %v108_v44 = vld [vmem:[#allocation2 + $0x268] sm:$0xff]  ;;  %v110_v46 = vld [vmem:[#allocation2 + $0x278] sm:$0xff]  ;;  %v494_v48 = vpack.c.bf16 %v101_v42, %v97_v40  ;;  %v103_v50 = vld [vmem:[#allocation2 + $0x240] sm:$0xff] }
  0x2d   :  { %483 = vmatpush1.bf16.msra.mxu1 %v482_v12  ;;  %425 = vmatprep.subr.bf16.mxu0 %v424_v13  ;;  %v436_v49 = vpack.c.bf16 %v108_v44, %v104_v43  ;;  %v107_v51 = vld [vmem:[#allocation2 + $0x260] sm:$0xff]  ;;  %v105_v52 = vld [vmem:[#allocation2 + $0x250] sm:$0xff]  ;;  %v496_v53 = vpack.c.bf16 %v110_v46, %v106_v45  ;;  %v112_v55 = vld [vmem:[#allocation2 + $0x288] sm:$0xff] }
  0x2e   :  { %485 = vmatprep.subr.bf16.mxu1 %v484_v17  ;;  %v109_v54 = vld [vmem:[#allocation2 + $0x270] sm:$0xff]  ;;  %v116_v56 = vld [vmem:[#allocation2 + $0x2a8] sm:$0xff]  ;;  %v114_v57 = vld [vmem:[#allocation2 + $0x298] sm:$0xff]  ;;  %v438_v59 = vpack.c.bf16 %v107_v51, %v103_v50 }
  0x2f   :  { %v118_v58 = vld [vmem:[#allocation2 + $0x2b8] sm:$0xff]  ;;  %v498_v60 = vpack.c.bf16 %v109_v54, %v105_v52  ;;  %v440_v61 = vpack.c.bf16 %v116_v56, %v112_v55  ;;  %v111_v62 = vld [vmem:[#allocation2 + $0x280] sm:$0xff]  ;;  %v113_v0 = vld [vmem:[#allocation2 + $0x290] sm:$0xff] }
  0x30   :  { %427 = vmatpush1.bf16.msra.mxu0 %v426_v23  ;;  %v115_v63 = vld [vmem:[#allocation2 + $0x2a0] sm:$0xff]  ;;  %v500_v1 = vpack.c.bf16 %v118_v58, %v114_v57  ;;  %v117_v2 = vld [vmem:[#allocation2 + $0x2b0] sm:$0xff]  ;;  %v120_v3 = vld [vmem:[#allocation2 + $0x2c8] sm:$0xff] }
  0x31   :  { %487 = vmatpush1.bf16.msra.mxu1 %v486_v24  ;;  %429 = vmatprep.subr.bf16.mxu0 %v428_v25  ;;  %v124_v4 = vld [vmem:[#allocation2 + $0x2e8] sm:$0xff]  ;;  %v122_v5 = vld [vmem:[#allocation2 + $0x2d8] sm:$0xff]  ;;  %v442_v7 = vpack.c.bf16 %v115_v63, %v111_v62  ;;  %v119_v8 = vld [vmem:[#allocation2 + $0x2c0] sm:$0xff]  ;;  %v502_v10 = vpack.c.bf16 %v117_v2, %v113_v0 }
  0x32   :  { %489 = vmatprep.subr.bf16.mxu1 %v488_v29  ;;  %v126_v6 = vld [vmem:[#allocation2 + $0x2f8] sm:$0xff]  ;;  %v123_v9 = vld [vmem:[#allocation2 + $0x2e0] sm:$0xff]  ;;  %v444_v11 = vpack.c.bf16 %v124_v4, %v120_v3  ;;  %v121_v12 = vld [vmem:[#allocation2 + $0x2d0] sm:$0xff] }
  0x33   :  { %v125_v13 = vld [vmem:[#allocation2 + $0x2f0] sm:$0xff]  ;;  %v30_v14 = vld [vmem:[%s640_s1 + $0x8] sm:$0xff]  ;;  %v504_v15 = vpack.c.bf16 %v126_v6, %v122_v5  ;;  %v305_v18 = vld [vmem:[%s641_s2] sm:$0xff]  ;;  %v446_v21 = vpack.c.bf16 %v123_v9, %v119_v8 }
  0x34   :  { %431 = vmatpush1.bf16.msra.mxu0 %v430_v35  ;;  %v128_v16 = vld [vmem:[#allocation2 + $0x308] sm:$0xff]  ;;  %398 = vmatprep.mubr.msk.f32.mxu0 %vm155_vm0, %v30_v14  ;;  %v130_v19 = vld [vmem:[#allocation2 + $0x318] sm:$0xff]  ;;  %v506_v23 = vpack.c.bf16 %v125_v13, %v121_v12  ;;  %v127_v25 = vld [vmem:[#allocation2 + $0x300] sm:$0xff] }
  0x35   :  { %491 = vmatpush1.bf16.msra.mxu1 %v490_v36  ;;  %433 = vmatprep.subr.bf16.mxu0 %v432_v37  ;;  %v132_v17 = vld [vmem:[#allocation2 + $0x328] sm:$0xff]  ;;  %v134_v20 = vld [vmem:[#allocation2 + $0x338] sm:$0xff]  ;;  %v131_v26 = vld [vmem:[#allocation2 + $0x320] sm:$0xff] }
  0x36   :  { %493 = vmatprep.subr.bf16.mxu1 %v492_v41  ;;  %399 = vmatprep.mubr.msk.f32.mxu1 %vm155_vm0, %v30_v14  ;;  %v306_v22 = vld [vmem:[%s641_s2 + $0x8] sm:$0x1]  ;;  %v448_v24 = vpack.c.bf16 %v132_v17, %v128_v16  ;;  %v129_v27 = vld [vmem:[#allocation2 + $0x310] sm:$0xff]  ;;  %v508_v28 = vpack.c.bf16 %v134_v20, %v130_v19  ;;  %v138_v32 = vld [vmem:[#allocation2 + $0x358] sm:$0xff]  ;;  %v450_v34 = vpack.c.bf16 %v131_v26, %v127_v25 }
  0x37   :  { %309 = vperm.xlu0 %526, %v305_v18   ;;  %v133_v29 = vld [vmem:[#allocation2 + $0x330] sm:$0xff]  ;;  %v136_v30 = vld [vmem:[#allocation2 + $0x348] sm:$0xff]  ;;  %v142_v33 = vld [vmem:[#allocation2 + $0x378] sm:$0xff] }
  0x38   :  { %435 = vmatpush1.bf16.msra.mxu0 %v434_v47  ;;  %v140_v31 = vld [vmem:[#allocation2 + $0x368] sm:$0xff]  ;;  %v510_v35 = vpack.c.bf16 %v133_v29, %v129_v27  ;;  %v135_v37 = vld [vmem:[#allocation2 + $0x340] sm:$0xff]  ;;  %v137_v39 = vld [vmem:[#allocation2 + $0x350] sm:$0xff]  ;;  %v512_v40 = vpack.c.bf16 %v142_v33, %v138_v32 }
  0x39   :  { %495 = vmatpush1.bf16.msra.mxu1 %v494_v48  ;;  %437 = vmatprep.subr.bf16.mxu0 %v436_v49  ;;  %v452_v36 = vpack.c.bf16 %v140_v31, %v136_v30  ;;  %v139_v38 = vld [vmem:[#allocation2 + $0x360] sm:$0xff]  ;;  %v141_v41 = vld [vmem:[#allocation2 + $0x370] sm:$0xff]  ;;  %v144_v42 = vld [vmem:[#allocation2 + $0x388] sm:$0xff] }
  0x3a   :  { %497 = vmatprep.subr.bf16.mxu1 %v496_v53  ;;  %v148_v43 = vld [vmem:[#allocation2 + $0x3a8] sm:$0xff]  ;;  %v146_v44 = vld [vmem:[#allocation2 + $0x398] sm:$0xff]  ;;  %v454_v46 = vpack.c.bf16 %v139_v38, %v135_v37  ;;  %v514_v47 = vpack.c.bf16 %v141_v41, %v137_v39  ;;  %v143_v49 = vld [vmem:[#allocation2 + $0x380] sm:$0xff] }
  0x3b   :  { %342 = vperm.xlu0 %526, %v306_v22   ;;  %v150_v45 = vld [vmem:[#allocation2 + $0x3b8] sm:$0xff]  ;;  %v456_v48 = vpack.c.bf16 %v148_v43, %v144_v42  ;;  %v147_v50 = vld [vmem:[#allocation2 + $0x3a0] sm:$0xff]  ;;  %v145_v52 = vld [vmem:[#allocation2 + $0x390] sm:$0xff] }
  0x3c   :  { %439 = vmatpush1.bf16.msra.mxu0 %v438_v59  ;;  %v516_v51 = vpack.c.bf16 %v150_v45, %v146_v44  ;;  %v149_v53 = vld [vmem:[#allocation2 + $0x3b0] sm:$0xff]  ;;  %v458_v54 = vpack.c.bf16 %v147_v50, %v143_v49  ;;  %v152_v56 = vld [vmem:[#allocation2 + $0x3c8] sm:$0xff]  ;;  %v154_v57 = vld [vmem:[#allocation2 + $0x3d8] sm:$0xff] }
  0x3d   :  { %499 = vmatpush1.bf16.msra.mxu1 %v498_v60  ;;  %441 = vmatprep.subr.bf16.mxu0 %v440_v61  ;;  %v518_v55 = vpack.c.bf16 %v149_v53, %v145_v52  ;;  %v151_v58 = vld [vmem:[#allocation2 + $0x3c0] sm:$0xff]  ;;  %v153_v59 = vld [vmem:[#allocation2 + $0x3d0] sm:$0xff] }
  0x3e   :  { %501 = vmatprep.subr.bf16.mxu1 %v500_v1  ;;  %v29_v60 = vld [vmem:[%s640_s1] sm:$0xff]  ;;  %s580_s1 = smov [#allocation5]  }
  0x3f   :  { %s389_s5 = sshll.u32 %s580_s1, 4  ;;  %s390_s5 = int_to_ptr.vmem [resolvable:$true] %s389_s5 }
  0x40   :  { %443 = vmatpush1.bf16.msra.mxu0 %v442_v7  ;;  %s549_s6 = scalar_lea.vmem %s390_s5, 64  ;;  %p554_p9 = scmp.lt.s32.totalorder %s390_s5, %s390_s5 }
  0x41   :  { %503 = vmatpush1.bf16.msra.mxu1 %v502_v10  ;;  %445 = vmatprep.subr.bf16.mxu0 %v444_v11  ;;  %p550_p8 = scmp.ne.s32.totalorder %s390_s5, %s549_s6  ;;  %p555_p10 = scmp.lt.s32.totalorder %s549_s6, %s549_s6 }
  0x42   :  { %505 = vmatprep.subr.bf16.mxu1 %v504_v15 }
  0x43   :  { %p556_p11 = por %p555_p10, %p554_p9 }
  0x44   :  { %447 = vmatpush1.bf16.msra.mxu0 %v446_v21  ;;  %v579_v21 = vmov 1966171168  }
  0x45   :  { %507 = vmatpush1.bf16.msra.mxu1 %v506_v23  ;;  %449 = vmatprep.subr.bf16.mxu0 %v448_v24  ;;  %v356_v22 = vunpack.c.l.s4 %v579_v21  ;;  %v358_v23 = vlaneseq  ;;  %p557_p12 = pnand %p556_p11, %p550_p8 }
  0x46   :  { %509 = vmatprep.subr.bf16.mxu1 %v508_v28 }
  0x47   :  { %v357_v32 = vunpack.c.0.s8 %v356_v22  ;;  %v359_v33 = vshrl.u32 %v358_v23, 7  ;;  %vm380_vm1 = vcmp.lt.s32.totalorder %v358_v23, 512 }
  0x48   :  { %451 = vmatpush1.bf16.msra.mxu0 %v450_v34 }
  0x49   :  { %511 = vmatpush1.bf16.msra.mxu1 %v510_v35  ;;  %453 = vmatprep.subr.bf16.mxu0 %v452_v36  ;;  %v360_v43 = vsub.s32 %v357_v32, %v359_v33 }
  0x4a   :  { %513 = vmatprep.subr.bf16.mxu1 %v512_v40 }
  0x4c   :  { %455 = vmatpush1.bf16.msra.mxu0 %v454_v46 }
  0x4d   :  { %515 = vmatpush1.bf16.msra.mxu1 %v514_v47  ;;  %457 = vmatprep.subr.bf16.mxu0 %v456_v48 }
  0x4e   :  { %517 = vmatprep.subr.bf16.mxu1 %v516_v51 }
  0x50   :  { %459 = vmatpush1.bf16.msra.mxu0 %v458_v54 }
  0x51   :  { %519 = vmatpush1.bf16.msra.mxu1 %v518_v55  ;;  %219 = vmatprep.subr.mxu0 %v152_v56 }
  0x52   :  { %290 = vmatprep.subr.mxu1 %v154_v57 }
  0x54   :  { %220 = vmatpush1.msra.mxu0 %v151_v58 }
  0x55   :  { %291 = vmatpush1.msra.mxu1 %v153_v59  ;;  %224 = vmatmul.mubr.f32.vlgmr.msra.gmra.mrb[0].mxu0 %v29_v60 }
  0x56   :  { %295 = vmatmul.mubr.f32.vlgmr.msra.gmra.mrb[0].mxu1 %v29_v60 }
  0xb6   :  { %v310_v1 = vpop.permute.xlu0 %309 }
  0xba   :  { %v343_v36 = vpop.permute.xlu0 %342 }
 0x128   :  { %v225_v61 = vpop.f32.mrb[0].mxu0 }
 0x129   :  { %v301_v62 = vmax.f32 %v225_v61, 0.0  ;;  %v296_v63 = vpop.f32.mrb[0].mxu1  ;;  %v227_v0 = vpop.f32.mrb[1].mxu0 }
 0x12a   :  { %v303_v2 = vmax.f32 %v296_v63, 0.0  ;;  %v302_v3 = vmax.f32 %v227_v0, 0.0  ;;  %v298_v4 = vpop.f32.mrb[1].mxu1 }
 0x12b   :  { %v312_v5 = vmul.f32 %v310_v1, %v301_v62  ;;  %v304_v6 = vmax.f32 %v298_v4, 0.0 }
 0x12c   :  { %v314_v7 = vmul.f32 %v310_v1, %v303_v2  ;;  %v313_v8 = vmul.f32 %v310_v1, %v302_v3 }
 0x12d   :  { %v316_v9 = vrot.slane %v312_v5, 4  ;;  %v315_v10 = vmul.f32 %v310_v1, %v304_v6 }
 0x12e   :  { %v328_v11 = vrot.slane %v314_v7, 4  ;;  %v322_v12 = vrot.slane %v313_v8, 4 }
 0x12f   :  { %v317_v13 = vadd.f32 %v316_v9, %v312_v5  ;;  %v334_v14 = vrot.slane %v315_v10, 4 }
 0x130   :  { %v329_v15 = vadd.f32 %v328_v11, %v314_v7  ;;  %v323_v16 = vadd.f32 %v322_v12, %v313_v8 }
 0x131   :  { %v318_v17 = vrot.slane %v317_v13, 2  ;;  %v335_v18 = vadd.f32 %v334_v14, %v315_v10 }
 0x132   :  { %v330_v19 = vrot.slane %v329_v15, 2  ;;  %v324_v20 = vrot.slane %v323_v16, 2 }
 0x133   :  { %v319_v24 = vadd.f32 %v318_v17, %v317_v13  ;;  %v336_v25 = vrot.slane %v335_v18, 2 }
 0x134   :  { %v331_v26 = vadd.f32 %v330_v19, %v329_v15  ;;  %v325_v27 = vadd.f32 %v324_v20, %v323_v16 }
 0x135   :  { %v337_v28 = vadd.f32 %v336_v25, %v335_v18  ;;  %v320_v29 = vrot.slane %v319_v24, 1 }
 0x136   :  { %v326_v30 = vrot.slane %v325_v27, 1  ;;  %v332_v31 = vrot.slane %v331_v26, 1 }
 0x137   :  { %v321_v34 = vadd.f32 %v320_v29, %v319_v24  ;;  %v338_v35 = vrot.slane %v337_v28, 1 }
 0x138   :  { %v327_v37 = vadd.f32 %v326_v30, %v325_v27  ;;  %v333_v38 = vadd.f32 %v332_v31, %v331_v26 }
 0x139   :  { %v339_v39 = vadd.f32 %v338_v35, %v337_v28  ;;  %v345_v40 = vadd.f32 %v343_v36, %v321_v34 }
 0x13a   :  { %v346_v41 = vadd.f32 %v343_v36, %v327_v37  ;;  %v347_v42 = vadd.f32 %v343_v36, %v333_v38 }
 0x13b   :  { %v348_v44 = vadd.f32 %v343_v36, %v339_v39 }
 0x13c   :  { %v353_v45 = vcombine.low %v345_v40, %v346_v41 }
 0x13d   :  { %v354_v46 = vcombine.low %v347_v42, %v348_v44 }
 0x13e   :  { %v361_v47 = vrot.slane %v353_v45, %v360_v43 }
 0x13f   :  { %v368_v48 = vrot.slane %v354_v46, %v360_v43 }
 0x141   :  { %v369_v49 = vcombine.low %v361_v47, %v368_v48 }
 0x143   :  { %v376_v50 = vrot.slane %v369_v49, %v360_v43 }
 0x145   :  { %382 = vst.msk [vmem:[#allocation5] sm:$0xf] %vm380_vm1, %v376_v50 }
 0x146   :  { %560 = shalt.err (!%p557_p12)
}
 0x147   :  { %s561_s9 = scalar_lea.hbm %s642_s3, 64 }
 0x148   :  { %p562_p13 = scmp.ne.s32.totalorder %s642_s3, %s561_s9  ;;  %p565_p0 = scmp.lt.u32.totalorder %s561_s9, %s642_s3 }
 0x14a   :  { %p567_p1 = pnand %p565_p0, %p562_p13 }
 0x14c   :  { %570 = shalt.err (!%p567_p1)
}
 0x14d   :  { %392 = dma.vmem_to_hbm [thread:$0]  %s390_s5, 64, %s642_s3, [#allocation4]  }
 0x14e   :  { %573 = dma.done.wait [#allocation4], 64  }
 0x14f   :  { %574 = vsyncadd [#allocation4], 4294967232 }
 0x150   :  { %396 = vsyncpa [#allocation3], 1 }
 0x151   :  { %397 = vsyncpa [#allocation4], 1 }

</bundles_post_ra>
